<compile_context>
chip_gen: v5e
topology: v5e:2x2
jax: 0.10.0
libtpu: 0.0.40
codegen_flags: <defaults>
</compile_context>

<pallas_src>
import functools

import jax
import jax.numpy as jnp
from jax.experimental import pallas as pl
from jax.experimental.pallas import tpu as pltpu


LABEL_SMOOTHING = 0.1
_F32_TEMPS = 5                      # conservative count of (tn, C) f32 intermediates
_TARGET_TILE_BYTES = 8 * 1024 * 1024  # raw logits bytes per tile (DMA efficiency target)


def _vmem_limit_bytes():
    """Per-generation VMEM budget: v7x has 64 MiB/TC, v5e/v6e have 128 MiB."""
    try:
        cap = int(pltpu.get_tpu_info().vmem_capacity_bytes)
    except Exception:
        cap = 64 * 1024 * 1024      # conservative fallback (v7x-sized VMEM)
    return min(int(cap * 0.8), 96 * 1024 * 1024)


def _weighted_ce_kernel(logits_ref, labels_ref, csum_ref, weights_ref, num_ref):
    """One batch tile -> per-row smoothed weighted NLL numerators (TN, 1)."""
    logits = logits_ref[...].astype(jnp.float32)      # (TN, C)
    labels = labels_ref[...]                          # (TN, 1) int32
    csum = csum_ref[...]                              # (TN, 1) f32  = (1-eps)*w_y + (eps/C)*sum(w)
    w = weights_ref[...]                              # (1,  C) f32

    c = logits.shape[-1]
    eps = LABEL_SMOOTHING

    # Numerically stable log-sum-exp along the class (lane) axis.
    m = jnp.max(logits, axis=-1, keepdims=True)                        # (TN, 1)
    shifted = logits - m                                               # (TN, C)
    lse = jnp.log(jnp.sum(jnp.exp(shifted), axis=-1, keepdims=True))   # (TN, 1)

    # Single full-tile f32 temp: weighted shifted logits.
    ws = shifted * w                                                   # (TN, C)
    sum_ws = jnp.sum(ws, axis=-1, keepdims=True)                       # (TN, 1)

    # Target-class pick via (1, C) iota broadcast against labels (TN, 1).
    class_ids = jax.lax.broadcasted_iota(jnp.int32, (1, c), 1)
    ws_y = jnp.sum(jnp.where(class_ids == labels, ws, 0.0),
                   axis=-1, keepdims=True)                             # (TN, 1) = w_y*shifted_y

    # numerator_row = -sum_c w_c*((1-eps)*onehot_c + eps/C) * logp_c
    #               = lse*coeff_sum - (1-eps)*w_y*shifted_y - (eps/C)*sum_c w_c*shifted_c
    num_ref[...] = lse * csum - (1.0 - eps) * ws_y - (eps / c) * sum_ws


@functools.partial(jax.jit, static_argnames=("block_n",))
def weighted_cross_entropy_loss(logits, labels, class_weights, *, block_n=None):
    """Weighted cross-entropy with label_smoothing=0.1, reduction='mean'.

    logits:        (N, C) float32 or bfloat16
    labels:        (N,)   int class indices
    class_weights: (C,)   float per-class weights
    block_n:       optional row-tile override (otherwise chosen by bytes)
    Returns a scalar float32 loss.
    """
    n, c = logits.shape
    eps = LABEL_SMOOTHING

    # Per-row scalars precomputed in XLA (cheap; removes per-tile kernel work).
    w_f32 = class_weights.astype(jnp.float32).reshape(c)
    labels_i32 = labels.astype(jnp.int32).reshape(n)
    w_y = jnp.take(w_f32, labels_i32, axis=0)                          # (N,)
    w_total = jnp.sum(w_f32)
    csum = (1.0 - eps) * w_y + (eps / c) * w_total                     # (N,)
    denominator = jnp.sum(w_y)

    # --- Tile-size selection by bytes -------------------------------------
    vmem_limit = _vmem_limit_bytes()
    in_itemsize = jnp.dtype(logits.dtype).itemsize
    row_align = 8 if in_itemsize == 4 else 16
    n_aligned = ((n + row_align - 1) // row_align) * row_align

    # VMEM bytes per batch row: double-buffered input tile + f32 intermediates
    # (plus a few bytes for the streamed per-row scalars).
    vmem_per_row = c * (2 * in_itemsize + _F32_TEMPS * 4) + 32
    max_rows_vmem = int((vmem_limit * 0.85) // vmem_per_row)
    target_rows = int(_TARGET_TILE_BYTES // max(1, c * in_itemsize))

    tn = block_n if block_n is not None else target_rows
    tn = min(tn, max_rows_vmem, n_aligned)
    tn = max(row_align, (tn // row_align) * row_align)

    n_pad = ((n + tn - 1) // tn) * tn
    pad = n_pad - n
    if pad:
        logits = jnp.pad(logits, ((0, pad), (0, 0)))
        labels_i32 = jnp.pad(labels_i32, (0, pad))
        csum = jnp.pad(csum, (0, pad))

    labels2d = labels_i32.reshape(n_pad, 1)
    csum2d = csum.reshape(n_pad, 1)
    weights2d = w_f32.reshape(1, c)

    num_blocks = n_pad // tn
    num_rows = pl.pallas_call(
        _weighted_ce_kernel,
        out_shape=jax.ShapeDtypeStruct((n_pad, 1), jnp.float32),
        grid=(num_blocks,),
        in_specs=[
            pl.BlockSpec((tn, c), lambda i: (i, 0)),   # logits tile (streamed)
            pl.BlockSpec((tn, 1), lambda i: (i, 0)),   # labels tile
            pl.BlockSpec((tn, 1), lambda i: (i, 0)),   # coeff_sum tile
            pl.BlockSpec((1, c), lambda i: (0, 0)),    # class weights (resident)
        ],
        out_specs=pl.BlockSpec((tn, 1), lambda i: (i, 0)),
        compiler_params=pltpu.CompilerParams(
            dimension_semantics=("parallel",),          # no carried state -> megacore-safe
            vmem_limit_bytes=vmem_limit,
        ),
    )(logits, labels2d, csum2d, weights2d)

    numerator = jnp.sum(num_rows[:n, 0])               # padded rows dropped here
    return numerator / denominator


class WeightedLoss:
    """JAX/Pallas port of the PyTorch WeightedLoss module."""

    def __init__(self, weights):
        self.weights = jnp.asarray(weights, dtype=jnp.float32)

    def __call__(self, outputs, labels, num_items_in_batch=None):
        # HF SequenceClassifierOutput unwrapping is pure glue; accept either a
        # raw logits array or any object exposing `.logits`.
        logits = getattr(outputs, "logits", outputs)
        return weighted_cross_entropy_loss(logits, labels, self.weights)


def _reference_loss(logits, labels, w, eps=LABEL_SMOOTHING):
    """Pure-JAX reference matching PyTorch F.cross_entropy semantics."""
    logits = logits.astype(jnp.float32)
    logp = jax.nn.log_softmax(logits, axis=-1)
    n, c = logits.shape
    w_y = w[labels]                                            # (N,)
    nll = -logp[jnp.arange(n), labels]                         # (N,)
    smooth = -jnp.sum(w[None, :] * logp, axis=-1)              # (N,)
    num = jnp.sum((1.0 - eps) * w_y * nll + (eps / c) * smooth)
    den = jnp.sum(w_y)
    return num / den


if __name__ == "__main__":
    key = jax.random.PRNGKey(0)
    k1, k2, k3, k4, k5, k6 = jax.random.split(key, 6)

    # Case 1: small aligned shapes (batch=8, num_classes=32), single grid step.
    N, C = 8, 32
    logits = jax.random.normal(k1, (N, C), dtype=jnp.float32)
    labels = jax.random.randint(k2, (N,), 0, C, dtype=jnp.int32)
    class_weights = jnp.linspace(0.5, 1.5, C, dtype=jnp.float32)

    loss_fn = WeightedLoss(class_weights)
    loss = jax.block_until_ready(loss_fn(logits, labels))
    ref = _reference_loss(logits, labels, class_weights)
    assert jnp.allclose(loss, ref, rtol=2e-5, atol=2e-5), (loss, ref)

    # Case 2: batch not a multiple of the tile; block_n=8 forces a 3-step grid,
    # exercising multi-block partials and padded-row slicing.
    N2 = 20
    logits2 = jax.random.normal(k3, (N2, C), dtype=jnp.float32)
    labels2 = jax.random.randint(k4, (N2,), 0, C, dtype=jnp.int32)
    loss2 = jax.block_until_ready(
        weighted_cross_entropy_loss(logits2, labels2, class_weights, block_n=8))
    ref2 = _reference_loss(logits2, labels2, class_weights)
    assert jnp.allclose(loss2, ref2, rtol=2e-5, atol=2e-5), (loss2, ref2)

    # Case 3: bf16 logits path (widened to f32 only inside the kernel).
    N3, C3 = 24, 128
    logits3 = jax.random.normal(k5, (N3, C3), dtype=jnp.float32).astype(jnp.bfloat16)
    labels3 = jax.random.randint(k6, (N3,), 0, C3, dtype=jnp.int32)
    class_weights3 = jnp.linspace(0.5, 1.5, C3, dtype=jnp.float32)
    loss3 = jax.block_until_ready(
        weighted_cross_entropy_loss(logits3, labels3, class_weights3))
    ref3 = _reference_loss(logits3.astype(jnp.float32), labels3, class_weights3)
    assert jnp.allclose(loss3, ref3, rtol=1e-3, atol=1e-3), (loss3, ref3)

    print("KERNEL_OK")
</pallas_src>

<mosaic_0001>
module attributes {stable_mosaic.version = 11 : i64} {
  func.func @_weighted_ce_kernel(%arg0: i32, %arg1: memref<8x32xf32, #tpu.memory_space<vmem>>, %arg2: memref<8x1xi32, #tpu.memory_space<vmem>>, %arg3: memref<8x1xf32, #tpu.memory_space<vmem>>, %arg4: memref<1x32xf32, #tpu.memory_space<vmem>>, %arg5: memref<8x1xf32, #tpu.memory_space<vmem>>) attributes {dimension_semantics = [#tpu.dimension_semantics<parallel>], iteration_bounds = array<i64: 1>, scalar_prefetch = 0 : i64, scratch_operands = 0 : i64, tpu.core_type = #tpu.core_type<tc>, window_params = [{transform_indices = @transform_0, window_bounds = array<i64: 8, 32>}, {transform_indices = @transform_1, window_bounds = array<i64: 8, 1>}, {transform_indices = @transform_2, window_bounds = array<i64: 8, 1>}, {pipeline_mode = #tpu.pipeline_mode<synchronous>, transform_indices = @transform_3, window_bounds = array<i64: 1, 32>}, {transform_indices = @transform_4, window_bounds = array<i64: 8, 1>}]} {
    %c0 = arith.constant 0 : index
    %c0_0 = arith.constant 0 : index
    %0 = vector.load %arg1[%c0, %c0_0] : memref<8x32xf32, #tpu.memory_space<vmem>>, vector<8x32xf32>
    %c0_1 = arith.constant 0 : index
    %c0_2 = arith.constant 0 : index
    %1 = vector.load %arg2[%c0_1, %c0_2] : memref<8x1xi32, #tpu.memory_space<vmem>>, vector<8x1xi32>
    %c0_3 = arith.constant 0 : index
    %c0_4 = arith.constant 0 : index
    %2 = vector.load %arg3[%c0_3, %c0_4] : memref<8x1xf32, #tpu.memory_space<vmem>>, vector<8x1xf32>
    %c0_5 = arith.constant 0 : index
    %c0_6 = arith.constant 0 : index
    %3 = vector.load %arg4[%c0_5, %c0_6] : memref<1x32xf32, #tpu.memory_space<vmem>>, vector<1x32xf32>
    %cst = arith.constant dense<0xFF800000> : vector<8xf32>
    %4 = vector.multi_reduction <maximumf>, %0, %cst [1] : vector<8x32xf32> to vector<8xf32>
    %5 = vector.shape_cast %4 : vector<8xf32> to vector<8x1xf32>
    %6 = vector.broadcast %5 : vector<8x1xf32> to vector<8x32xf32>
    %7 = arith.subf %0, %6 : vector<8x32xf32>
    %8 = math.exp %7 : vector<8x32xf32>
    %cst_7 = arith.constant dense<0.000000e+00> : vector<8xf32>
    %9 = vector.multi_reduction <add>, %8, %cst_7 [1] : vector<8x32xf32> to vector<8xf32>
    %10 = vector.shape_cast %9 : vector<8xf32> to vector<8x1xf32>
    %11 = math.log %10 : vector<8x1xf32>
    %12 = vector.broadcast %3 : vector<1x32xf32> to vector<8x32xf32>
    %13 = arith.mulf %7, %12 : vector<8x32xf32>
    %cst_8 = arith.constant dense<0.000000e+00> : vector<8xf32>
    %14 = vector.multi_reduction <add>, %13, %cst_8 [1] : vector<8x32xf32> to vector<8xf32>
    %15 = vector.shape_cast %14 : vector<8xf32> to vector<8x1xf32>
    %16 = tpu.iota {dimensions = array<i32: 1>} : vector<1x32xi32>
    %17 = vector.broadcast %16 : vector<1x32xi32> to vector<8x32xi32>
    %18 = vector.broadcast %1 : vector<8x1xi32> to vector<8x32xi32>
    %19 = arith.cmpi eq, %17, %18 : vector<8x32xi32>
    %cst_9 = arith.constant 0.000000e+00 : f32
    %20 = vector.broadcast %cst_9 : f32 to vector<8x32xf32>
    %21 = arith.select %19, %13, %20 : vector<8x32xi1>, vector<8x32xf32>
    %cst_10 = arith.constant dense<0.000000e+00> : vector<8xf32>
    %22 = vector.multi_reduction <add>, %21, %cst_10 [1] : vector<8x32xf32> to vector<8xf32>
    %23 = vector.shape_cast %22 : vector<8xf32> to vector<8x1xf32>
    %24 = arith.mulf %11, %2 : vector<8x1xf32>
    %cst_11 = arith.constant 0.899999976 : f32
    %25 = vector.broadcast %cst_11 : f32 to vector<8x1xf32>
    %26 = arith.mulf %25, %23 : vector<8x1xf32>
    %27 = arith.subf %24, %26 : vector<8x1xf32>
    %cst_12 = arith.constant 3.125000e-03 : f32
    %28 = vector.broadcast %cst_12 : f32 to vector<8x1xf32>
    %29 = arith.mulf %28, %15 : vector<8x1xf32>
    %30 = arith.subf %27, %29 : vector<8x1xf32>
    %c0_13 = arith.constant 0 : index
    %c0_14 = arith.constant 0 : index
    %31 = vector.load %arg5[%c0_13, %c0_14] : memref<8x1xf32, #tpu.memory_space<vmem>>, vector<8x1xf32>
    tpu.vector_store %arg5[%c0_13, %c0_14], %30 {strides = array<i32>} : memref<8x1xf32, #tpu.memory_space<vmem>>, vector<8x1xf32>,
    return
  }
  func.func @transform_0(%arg0: i32) -> (i32, i32) {
    %c0_i32 = arith.constant 0 : i32
    %c0_i32_0 = arith.constant 0 : i32
    return %arg0, %c0_i32 : i32, i32
  }
  func.func @transform_1(%arg0: i32) -> (i32, i32) {
    %c0_i32 = arith.constant 0 : i32
    %c0_i32_0 = arith.constant 0 : i32
    return %arg0, %c0_i32 : i32, i32
  }
  func.func @transform_2(%arg0: i32) -> (i32, i32) {
    %c0_i32 = arith.constant 0 : i32
    %c0_i32_0 = arith.constant 0 : i32
    return %arg0, %c0_i32 : i32, i32
  }
  func.func @transform_3(%arg0: i32) -> (i32, i32) {
    %c0_i32 = arith.constant 0 : i32
    %c0_i32_0 = arith.constant 0 : i32
    %c0_i32_1 = arith.constant 0 : i32
    return %c0_i32, %c0_i32_0 : i32, i32
  }
  func.func @transform_4(%arg0: i32) -> (i32, i32) {
    %c0_i32 = arith.constant 0 : i32
    %c0_i32_0 = arith.constant 0 : i32
    return %arg0, %c0_i32 : i32, i32
  }
}

</mosaic_0001>

<bundles_post_ra>
// kernel: weighted_cross_entropy_loss.1
= control target key start
LH: loop header
LB: loop body
LE: loop exit
PB: predicated region body
PF: predicated region fallthrough
CT: control target
= control target key end

     0   :  { %vm21_vm0 = vcmask 261120   ;;  %v68_v1 = vmov 0   ;;  %v40_v12 = vlaneseq  ;;  %vm55_vm2 = vcmask 7168   ;;  %s113_s0 = inlined_call_operand.vmem [shape: f32[8,32], index: 0, kind: input, shape index: {}]   ;;  %s114_s3 = inlined_call_operand.vmem [shape: f32[1,32], index: 3, kind: input, shape index: {}]   ;;  %s115_s1 = inlined_call_operand.vmem [shape: s32[8,1], index: 1, kind: input, shape index: {}]   ;;  %s116_s2 = inlined_call_operand.vmem [shape: f32[8,1], index: 2, kind: input, shape index: {}]   ;;  %s117_s4 = inlined_call_operand.vmem [shape: f32[8,1], index: 4, kind: output, shape index: {}]  }
   0x1   :  { %v17_v0 = vld [vmem:[%s113_s0] sm:$0xff]  ;;  %62 = vset.pattern.permute.xlu0 %v68_v1 }
   0x2   :  { %v22_v2 = vsel %vm21_vm0, %v17_v0, -inf  ;;  %v18_v3 = vld [vmem:[%s115_s1] sm:$0xff]  ;;  %v41_v13 = vand.u32 127, %v40_v12 }
   0x3   :  { %23 = vmax.xlane.f32.xlu0 %v22_v2  ;;  %v63_v4 = vld [vmem:[%s114_s3] ss:$0 sm:$0xff] }
   0x4   :  { %v19_v19 = vld [vmem:[%s116_s2] sm:$0xff] }
  0x17   :  { %43 = vperm.xlu0 %62, %v18_v3  }
  0x76   :  { %v24_v5 = vpop.xlane.xlu0 %23 }
  0x77   :  { %v25_v6 = vsub.f32 %v17_v0, %v24_v5 }
  0x79   :  { %v26_v7 = vmul.f32 1.442695, %v25_v6  ;;  %v36_v8 = vmul.f32 %v63_v4, %v25_v6 }
  0x7b   :  { %64 = vpow2.f32 %v26_v7  ;;  %v37_v9 = vsel %vm21_vm0, %v36_v8, 0.0 }
  0x7c   :  { %38 = vadd.xlane.f32.xlu2 %v37_v9 }
  0x81   :  { %v65_v10 = vpop.eup %64 }
  0x82   :  { %v28_v11 = vsel %vm21_vm0, %v65_v10, 0.0 }
  0x83   :  { %29 = vadd.xlane.f32.xlu1 %v28_v11 }
  0x89   :  { %v44_v14 = vpop.permute.xlu0 %43 }
  0x8a   :  { %vm45_vm1 = vcmp.eq.s32.totalorder %v41_v13, %v44_v14 }
  0x8b   :  { %v46_v15 = vsel %vm45_vm1, %v36_v8, 0.0 }
  0x8c   :  { %v47_v16 = vsel %vm21_vm0, %v46_v15, 0.0 }
  0x8d   :  { %48 = vadd.xlane.f32.xlu1 %v47_v16 }
  0xef   :  { %v39_v21 = vpop.xlane.xlu2 %38 }
  0xf0   :  { %v53_v25 = vmul.f32 0.003125, %v39_v21 }
  0xf6   :  { %v30_v17 = vpop.xlane.xlu1 %29 }
  0xf7   :  { %66 = vlog2.f32 %v30_v17 }
  0xfd   :  { %v67_v18 = vpop.eup %66 }
  0xfe   :  { %v32_v20 = vmul.f32 0.6931472, %v67_v18 }
 0x100   :  { %v50_v22 = vmul.f32 %v32_v20, %v19_v19  ;;  %v49_v23 = vpop.xlane.xlu1 %48 }
 0x101   :  { %v51_v24 = vmul.f32 0.9, %v49_v23 }
 0x103   :  { %v52_v26 = vsub.f32 %v50_v22, %v51_v24 }
 0x105   :  { %v54_v27 = vsub.f32 %v52_v26, %v53_v25 }
 0x107   :  { %56 = vst.msk [vmem:[%s117_s4] sm:$0xff] %vm55_vm2, %v54_v27 }

</bundles_post_ra>
